<compile_context>
chip_gen: v6e
topology: v6e:2x2x1
jax: 0.10.0
libtpu: 0.0.40
codegen_flags: <defaults>
</compile_context>

<pallas_src>
import math

import jax
import jax.numpy as jnp
import numpy as np
from jax.experimental import pallas as pl
from jax.experimental.pallas import tpu as pltpu

_LANE = 128                       # vreg lane width
_SUBLANE = 8                      # f32 sublane count
_TARGET_BLOCK_BYTES = 4 * 1024 * 1024   # ~4 MiB per block (fits all gens' VMEM
                                        # with double buffering, incl. v7x 64 MiB)


def _identity_kernel(x_ref, o_ref):
    # Whole-tile VMEM load + store (elementwise identity).
    o_ref[...] = x_ref[...]


def decoder_forward(x: jax.Array) -> jax.Array:
    """Pallas 'forward' for the (empty) Decoder: identity on the latent batch."""
    orig_shape = x.shape
    dtype = x.dtype
    itemsize = jnp.dtype(dtype).itemsize
    total = math.prod(orig_shape) if orig_shape else 1

    if total % (_SUBLANE * _LANE) == 0:
        # Lane-dense view: (rows, 128).  rows is guaranteed a multiple of 8.
        rows = total // _LANE
        x2 = x.reshape(rows, _LANE)
        tb = (_TARGET_BLOCK_BYTES // (_LANE * itemsize)) // _SUBLANE * _SUBLANE
        tb = max(_SUBLANE, min(tb, rows))
        grid = (pl.cdiv(rows, tb),)
        block = (tb, _LANE)
    else:
        # Tiny / ragged total: single block equal to the full (flattened) array
        # (legal via the full-dims exception to the (8,128) rule).
        x2 = x.reshape(1, total)
        grid = (1,)
        block = (1, total)

    out = pl.pallas_call(
        _identity_kernel,
        out_shape=jax.ShapeDtypeStruct(x2.shape, dtype),
        grid=grid,
        in_specs=[pl.BlockSpec(block, lambda i: (i, 0))],
        out_specs=pl.BlockSpec(block, lambda i: (i, 0)),
        input_output_aliases={0: 0},  # output aliases the input buffer
        compiler_params=pltpu.CompilerParams(
            dimension_semantics=("parallel",),
        ),
    )(x2)
    return out.reshape(orig_shape)


if __name__ == "__main__":
    latent_dim = 32
    batch = 2

    key = jax.random.PRNGKey(0)
    x = jax.random.normal(key, (batch, latent_dim), dtype=jnp.float32)
    x_host = np.asarray(jax.device_get(x))  # host reference (alias-safe)

    out = jax.block_until_ready(decoder_forward(x))
    assert out.shape == (batch, latent_dim)
    assert out.dtype == jnp.float32
    assert np.array_equal(np.asarray(jax.device_get(out)), x_host)

    # Exercise the lane-dense (rows, 128) path with a second small input whose
    # element count is a multiple of 8*128.
    y = jax.random.normal(jax.random.PRNGKey(0), (64, 32), dtype=jnp.float32)
    y_host = np.asarray(jax.device_get(y))
    out2 = jax.block_until_ready(decoder_forward(y))
    assert out2.shape == (64, 32)
    assert np.array_equal(np.asarray(jax.device_get(out2)), y_host)

    print("KERNEL_OK")
</pallas_src>

<mosaic_0001>
module attributes {stable_mosaic.version = 11 : i64} {
  func.func @_identity_kernel(%arg0: i32, %arg1: memref<1x64xf32, #tpu.memory_space<vmem>>, %arg2: memref<1x64xf32, #tpu.memory_space<vmem>>) attributes {dimension_semantics = [#tpu.dimension_semantics<parallel>], iteration_bounds = array<i64: 1>, scalar_prefetch = 0 : i64, scratch_operands = 0 : i64, tpu.core_type = #tpu.core_type<tc>, window_params = [{transform_indices = @transform_0, window_bounds = array<i64: 1, 64>}, {transform_indices = @transform_1, window_bounds = array<i64: 1, 64>}]} {
    %c0 = arith.constant 0 : index
    %c0_0 = arith.constant 0 : index
    %0 = vector.load %arg1[%c0, %c0_0] : memref<1x64xf32, #tpu.memory_space<vmem>>, vector<1x64xf32>
    %c0_1 = arith.constant 0 : index
    %c0_2 = arith.constant 0 : index
    %1 = vector.load %arg2[%c0_1, %c0_2] : memref<1x64xf32, #tpu.memory_space<vmem>>, vector<1x64xf32>
    tpu.vector_store %arg2[%c0_1, %c0_2], %0 {strides = array<i32>} : memref<1x64xf32, #tpu.memory_space<vmem>>, vector<1x64xf32>,
    return
  }
  func.func @transform_0(%arg0: i32) -> (i32, i32) {
    %c0_i32 = arith.constant 0 : i32
    %c0_i32_0 = arith.constant 0 : i32
    return %arg0, %c0_i32 : i32, i32
  }
  func.func @transform_1(%arg0: i32) -> (i32, i32) {
    %c0_i32 = arith.constant 0 : i32
    %c0_i32_0 = arith.constant 0 : i32
    return %arg0, %c0_i32 : i32, i32
  }
}

</mosaic_0001>

<bundles_post_ra>
// kernel: tpu_custom_call.1
= control target key start
LH: loop header
LB: loop body
LE: loop exit
PB: predicated region body
PF: predicated region fallthrough
CT: control target
= control target key end

     0   :  { %6 = vsyncpa [#allocation3], 0  ;;  %s103_s0 = inlined_call_operand.hbm [shape: f32[1,64], index: 0, kind: input, shape index: {}, may-alias: {0,1}]   ;;  %s104_s1 = inlined_call_operand.hbm [shape: f32[1,64], index: 1, kind: output, shape index: {}, may-alias: {0,1}]  }
   0x1   :  { %7 = vsyncpa [#allocation4], 0  ;;  %s85_s6 = smov [#allocation2]  }
   0x2   :  { %s14_s7 = sshll.u32 %s85_s6, 4  ;;  %s15_s7 = int_to_ptr.vmem [resolvable:$true] %s14_s7 }
   0x3   :  { %s49_s8 = scalar_lea.vmem %s15_s7, 16  ;;  %s53_s9 = scalar_lea.vmem %s15_s7, 32 }
   0x4   :  { %p50_p0 = scmp.ne.s32.totalorder %s15_s7, %s49_s8  ;;  %p54_p1 = scmp.lt.s32.totalorder %s15_s7, %s15_s7 }
   0x5   :  { %p55_p2 = scmp.lt.s32.totalorder %s53_s9, %s49_s8 }
   0x7   :  { %p56_p3 = por %p55_p2, %p54_p1 }
   0x9   :  { %p57_p4 = pnand %p56_p3, %p50_p0 }
   0xb   :  { %60 = shalt.err (!%p57_p4)
}
   0xc   :  { %17 = dma.hbm_to_vmem [thread:$0]  %s103_s0, 16, %s15_s7, [#allocation3]  }
   0xd   :  { %81 = dma.done.wait [#allocation3], 16  }
   0xe   :  { %82 = vsyncadd [#allocation3], 4294967280  ;;  %s86_s12 = smov [#allocation5]   ;;  %vm22_vm0 = vcmask 516096   ;;  %v21_v0 = vld [vmem:[#allocation2] sm:$0x1] }
   0xf   :  { %s30_s13 = sshll.u32 %s86_s12, 4  ;;  %23 = vst.msk [vmem:[#allocation5] sm:$0x1] %vm22_vm0, %v21_v0  ;;  %s31_s13 = int_to_ptr.vmem [resolvable:$true] %s30_s13 }
  0x10   :  { %s61_s14 = scalar_lea.vmem %s31_s13, 16  ;;  %s65_s15 = scalar_lea.vmem %s31_s13, 32 }
  0x11   :  { %p62_p5 = scmp.ne.s32.totalorder %s31_s13, %s61_s14  ;;  %p66_p6 = scmp.lt.s32.totalorder %s31_s13, %s31_s13 }
  0x12   :  { %p67_p7 = scmp.lt.s32.totalorder %s65_s15, %s61_s14 }
  0x14   :  { %p68_p8 = por %p67_p7, %p66_p6 }
  0x16   :  { %p69_p9 = pnand %p68_p8, %p62_p5 }
  0x18   :  { %72 = shalt.err (!%p69_p9)
}
  0x19   :  { %33 = dma.vmem_to_hbm [thread:$0]  %s31_s13, 16, %s104_s1, [#allocation4]  }
  0x1a   :  { %83 = dma.done.wait [#allocation4], 16  }
  0x1b   :  { %84 = vsyncadd [#allocation4], 4294967280 }
  0x1c   :  { %37 = vsyncpa [#allocation3], 1 }
  0x1d   :  { %38 = vsyncpa [#allocation4], 1 }

</bundles_post_ra>
